<compile_context>
chip_gen: v6e
topology: v6e:2x2x1
jax: 0.10.0
libtpu: 0.0.40
codegen_flags: <defaults>
</compile_context>

<pallas_src>
import functools
import numpy as np

import jax
import jax.numpy as jnp
from jax import lax
from jax.experimental import pallas as pl
from jax.experimental.pallas import tpu as pltpu

BN_EPS = 1e-5


def _res_unit_kernel(head_ref, xt_ref, wc_ref, aff_ref, *rest,
                     k, dilation, halo, hpad, pad_r, res_mode):
    """One (batch, L-tile) step.

    head_ref : (1, c_in, hpad)    halo seed for the first tile of each sequence
    xt_ref   : (1, c_in, TL)      new input columns for this tile (compute dtype)
    wc_ref   : (c_out, k*c_in)    tap-fused conv weight
    aff_ref  : (c_out, 3) f32     [conv bias, bn scale, bn shift (+ folded residual bias)]
    wr_ref   : (c_out, c_in)      residual 1x1 weight (only present when res_mode == "project")
    o_ref    : (1, c_out, TL)     output tile (NCL, lane-dense on TL)
    win_ref  : (c_in, TL + hpad)  persistent window: halo carry + current tile
    col_ref  : (k*c_in, TL)       im2col buffer
    """
    if res_mode == "project":
        wr_ref, o_ref, win_ref, col_ref = rest
    else:
        wr_ref = None
        o_ref, win_ref, col_ref = rest

    l = pl.program_id(1)
    c_out = o_ref.shape[1]
    TL = o_ref.shape[2]
    c_in = xt_ref.shape[1]

    # Seed the halo carry at the start of every sequence (l == 0 for each batch element).
    @pl.when(l == 0)
    def _():
        win_ref[:, :hpad] = head_ref[0]

    # Append this tile's TL new input columns (lane-aligned store at offset hpad).
    win_ref[:, hpad:] = xt_ref[0]
    win = win_ref[...]                                   # (c_in, TL + hpad), compute dtype

    # im2col: col[kk*c_in + ci, t] = x_padded[ci, t + kk*dilation]   (k cheap static slice-copies).
    base = hpad - halo
    for kk in range(k):                                  # static unroll (k is small)
        off = base + kk * dilation
        col_ref[kk * c_in:(kk + 1) * c_in, :] = win[:, off:off + TL]

    # Conv1d == a single MXU matmul with contraction k*c_in; accumulate in f32.
    acc = jnp.dot(wc_ref[...], col_ref[...], preferred_element_type=jnp.float32)   # (c_out, TL)

    aff = aff_ref[...]                                   # (c_out, 3) f32
    acc = acc + aff[:, 0:1]                              # conv bias
    acc = jnp.maximum(acc, 0.0)                          # ReLU
    acc = acc * aff[:, 1:2] + aff[:, 2:3]                # BatchNorm1d (eval) folded to an affine
    # TODO(synk): Dropout(p) is identity in eval mode; train-mode stochastic masking not implemented.

    # Residual branch reuses the same window (no second HBM stream of the input).
    xres = win[:, hpad - pad_r:hpad - pad_r + TL]        # (c_in, TL) == the original x tile
    if res_mode == "project":                            # match_residual: learned 1x1 conv
        res = jnp.dot(wr_ref[...], xres, preferred_element_type=jnp.float32)
    elif res_mode == "identity":                         # c_in == c_out
        res = xres.astype(jnp.float32)
    else:                                                # c_in == 1: broadcast-add over channels
        res = jnp.broadcast_to(xres.astype(jnp.float32), (c_out, TL))

    o_ref[0] = (res + acc).astype(o_ref.dtype)

    # Carry the trailing hpad window columns to the front for the next L tile of this sequence
    # (skipped on the last tile: the next grid step re-seeds from head_ref anyway).
    @pl.when(l + 1 < pl.num_programs(1))
    def _():
        win_ref[:, :hpad] = win[:, TL:TL + hpad]


def res_unit_forward(x_ncl, params, *, k=8, dilation=1, stride=1,
                     tile_l=512, compute_dtype=jnp.bfloat16):
    """x_ncl: (B, c_in, L) float32 -> (B, c_out, L) float32 (PyTorch ResUnit forward, eval mode)."""
    assert stride == 1, "ResUnit default stride=1 (same-length output)"
    B, c_in, L = x_ncl.shape
    w_conv = params["w_conv"]                            # (c_out, c_in, k)
    c_out = w_conv.shape[0]
    assert w_conv.shape == (c_out, c_in, k)

    # conv1d_same_padding (stride=1): total pad = dilation*(k-1); if odd, the extra zero is on the right.
    halo = dilation * (k - 1)
    pad_l = halo // 2
    pad_r = halo - pad_l

    # Lane-aligned halo-carry width and L tile (both multiples of 128 -> aligned window stores and
    # lane-dense output stores).  Tiles are sized to sit well under the default scoped VMEM limit
    # (32 MiB) on all generations, including v7x's 64 MiB physical VMEM.
    hpad = max(128, ((halo + 127) // 128) * 128)
    TL = ((max(128, min(tile_l, L)) + 127) // 128) * 128
    nL = pl.cdiv(L, TL)
    Lpad = nL * TL

    xc = x_ncl.astype(compute_dtype)                     # bf16 by default: halves HBM read traffic

    # head: x-indices [pad_r - hpad, pad_r) (zeros outside [0, L)) -> seeds the window at l == 0.
    pr = min(pad_r, L)
    head = jnp.pad(xc[:, :, :pr], ((0, 0), (0, 0), (hpad - pad_r, pad_r - pr)))
    # tail: x-indices [pad_r, pad_r + Lpad) -> streamed tile-by-tile (zeros past the end of x).
    tail = jnp.pad(xc[:, :, pad_r:], ((0, 0), (0, 0), (0, Lpad - max(L - pad_r, 0))))

    # Tap-fused conv weight: w_fused[co, kk*c_in + ci] = w_conv[co, ci, kk].
    w_fused = jnp.transpose(w_conv, (0, 2, 1)).reshape(c_out, k * c_in).astype(compute_dtype)

    # BatchNorm (eval) folded to a per-channel affine (cannot fold into the conv: ReLU in between).
    scale = params["gamma"].astype(jnp.float32) * lax.rsqrt(params["var"].astype(jnp.float32) + BN_EPS)
    shift = params["beta"].astype(jnp.float32) - params["mean"].astype(jnp.float32) * scale

    if c_in > 1 and c_in != c_out:                       # match_residual: learned 1x1 projection
        res_mode = "project"
        w_res = params["w_res"][:, :, 0].astype(compute_dtype)            # (c_out, c_in)
        shift = shift + params["b_res"].astype(jnp.float32)               # fold residual bias
    elif c_in == c_out:                                  # identity residual
        res_mode = "identity"
        w_res = None
    else:                                                # c_in == 1: PyTorch broadcast add
        res_mode = "broadcast"
        w_res = None

    affine = jnp.stack([params["b_conv"].astype(jnp.float32), scale, shift], axis=1)   # (c_out, 3)

    kernel = functools.partial(_res_unit_kernel, k=k, dilation=dilation,
                               halo=halo, hpad=hpad, pad_r=pad_r, res_mode=res_mode)

    in_specs = [
        pl.BlockSpec((1, c_in, hpad), lambda b, l: (b, 0, 0)),            # halo seed
        pl.BlockSpec((1, c_in, TL), lambda b, l: (b, 0, l)),              # streamed input tile
        pl.BlockSpec((c_out, k * c_in), lambda b, l: (0, 0)),             # fused conv weight
        pl.BlockSpec((c_out, 3), lambda b, l: (0, 0)),                    # [b_conv, bn_scale, bn_shift]
    ]
    operands = [head, tail, w_fused, affine]
    if res_mode == "project":
        in_specs.append(pl.BlockSpec((c_out, c_in), lambda b, l: (0, 0)))  # residual 1x1 weight
        operands.append(w_res)

    out = pl.pallas_call(
        kernel,
        out_shape=jax.ShapeDtypeStruct((B, c_out, Lpad), jnp.float32),
        grid_spec=pltpu.PrefetchScalarGridSpec(
            num_scalar_prefetch=0,
            grid=(B, nL),
            in_specs=in_specs,
            out_specs=pl.BlockSpec((1, c_out, TL), lambda b, l: (b, 0, l)),
            scratch_shapes=[
                pltpu.VMEM((c_in, TL + hpad), compute_dtype),             # halo window (carried over l)
                pltpu.VMEM((k * c_in, TL), compute_dtype),                # im2col buffer
            ],
        ),
        # B is parallel (feeds both TensorCores on v7x); the L axis carries the halo -> sequential.
        compiler_params=pltpu.CompilerParams(
            dimension_semantics=("parallel", "arbitrary")),
    )(*operands)

    return out[:, :, :L]


def reference_forward(x, params, *, k=8, dilation=1, stride=1):
    """Pure-JAX reference matching the PyTorch module (eval mode)."""
    B, c_in, L = x.shape
    c_out = params["w_conv"].shape[0]
    pad = (L - 1) * stride - L + dilation * (k - 1) + 1
    xpad = x
    if pad % 2 != 0:
        xpad = jnp.pad(xpad, ((0, 0), (0, 0), (0, 1)))
    y = lax.conv_general_dilated(
        xpad, params["w_conv"], (stride,), [(pad // 2, pad // 2)],
        rhs_dilation=(dilation,), dimension_numbers=("NCH", "OIH", "NCH"),
    ) + params["b_conv"][None, :, None]
    y = jnp.maximum(y, 0.0)
    y = ((y - params["mean"][None, :, None])
         * lax.rsqrt(params["var"][None, :, None] + BN_EPS)
         * params["gamma"][None, :, None] + params["beta"][None, :, None])
    if c_in > 1 and c_in != c_out:
        res = lax.conv_general_dilated(
            x, params["w_res"], (1,), "VALID",
            dimension_numbers=("NCH", "OIH", "NCH"),
        ) + params["b_res"][None, :, None]
    else:
        res = x
    return res + y


if __name__ == "__main__":
    key = jax.random.PRNGKey(0)

    def make_params(pkey, c_in, c_out, k):
        ks = jax.random.split(pkey, 8)
        return dict(
            w_conv=0.1 * jax.random.normal(ks[0], (c_out, c_in, k), jnp.float32),
            b_conv=0.1 * jax.random.normal(ks[1], (c_out,), jnp.float32),
            w_res=0.1 * jax.random.normal(ks[2], (c_out, c_in, 1), jnp.float32),
            b_res=0.1 * jax.random.normal(ks[3], (c_out,), jnp.float32),
            gamma=1.0 + 0.1 * jax.random.normal(ks[4], (c_out,), jnp.float32),
            beta=0.1 * jax.random.normal(ks[5], (c_out,), jnp.float32),
            mean=0.1 * jax.random.normal(ks[6], (c_out,), jnp.float32),
            var=jnp.abs(1.0 + 0.1 * jax.random.normal(ks[7], (c_out,), jnp.float32)),
        )

    k1, k2, k3, k4, k5 = jax.random.split(key, 5)

    # Case 1: match_residual (c_in != c_out) -> learned 1x1 projection on the residual branch.
    B, c_in, c_out, L, k = 2, 4, 8, 16, 8
    x = jax.random.normal(k1, (B, c_in, L), jnp.float32)
    params = make_params(k2, c_in, c_out, k)

    out_bf16 = jax.block_until_ready(res_unit_forward(x, params, k=k))                       # bf16 MXU path
    out_f32 = jax.block_until_ready(res_unit_forward(x, params, k=k, compute_dtype=jnp.float32))
    ref = reference_forward(x, params, k=k)
    assert out_bf16.shape == (B, c_out, L)
    np.testing.assert_allclose(np.asarray(out_f32), np.asarray(ref), rtol=1e-4, atol=1e-4)
    np.testing.assert_allclose(np.asarray(out_bf16), np.asarray(ref), rtol=5e-2, atol=5e-2)

    # Case 2: identity residual (c_in == c_out).
    c_in2 = c_out2 = 8
    x2 = jax.random.normal(k3, (B, c_in2, L), jnp.float32)
    params2 = make_params(k4, c_in2, c_out2, k)
    out2 = jax.block_until_ready(res_unit_forward(x2, params2, k=k, compute_dtype=jnp.float32))
    ref2 = reference_forward(x2, params2, k=k)
    np.testing.assert_allclose(np.asarray(out2), np.asarray(ref2), rtol=1e-4, atol=1e-4)

    # Case 3: multi-tile sequence with dilation -> exercises the cross-tile halo carry.
    L3, dil3 = 300, 2
    x3 = jax.random.normal(k5, (B, c_in, L3), jnp.float32)
    out3 = jax.block_until_ready(
        res_unit_forward(x3, params, k=k, dilation=dil3, tile_l=128, compute_dtype=jnp.float32))
    ref3 = reference_forward(x3, params, k=k, dilation=dil3)
    np.testing.assert_allclose(np.asarray(out3), np.asarray(ref3), rtol=1e-4, atol=1e-4)

    print("KERNEL_OK")
</pallas_src>

<mosaic_0001>
module attributes {stable_mosaic.version = 11 : i64} {
  func.func @_res_unit_kernel(%arg0: i32, %arg1: i32, %arg2: memref<1x4x128xbf16, #tpu.memory_space<vmem>>, %arg3: memref<1x4x128xbf16, #tpu.memory_space<vmem>>, %arg4: memref<8x32xbf16, #tpu.memory_space<vmem>>, %arg5: memref<8x3xf32, #tpu.memory_space<vmem>>, %arg6: memref<8x4xbf16, #tpu.memory_space<vmem>>, %arg7: memref<1x8x128xf32, #tpu.memory_space<vmem>>, %arg8: memref<4x256xbf16, #tpu.memory_space<vmem>>, %arg9: memref<32x128xbf16, #tpu.memory_space<vmem>>) attributes {dimension_semantics = [#tpu.dimension_semantics<parallel>, #tpu.dimension_semantics<arbitrary>], iteration_bounds = array<i64: 2, 1>, scalar_prefetch = 0 : i64, scratch_operands = 2 : i64, tpu.core_type = #tpu.core_type<tc>, window_params = [{transform_indices = @transform_0, window_bounds = array<i64: 1, 4, 128>}, {transform_indices = @transform_1, window_bounds = array<i64: 1, 4, 128>}, {pipeline_mode = #tpu.pipeline_mode<synchronous>, transform_indices = @transform_2, window_bounds = array<i64: 8, 32>}, {pipeline_mode = #tpu.pipeline_mode<synchronous>, transform_indices = @transform_3, window_bounds = array<i64: 8, 3>}, {pipeline_mode = #tpu.pipeline_mode<synchronous>, transform_indices = @transform_4, window_bounds = array<i64: 8, 4>}, {transform_indices = @transform_5, window_bounds = array<i64: 1, 8, 128>}]} {
    %c0_i32 = arith.constant 0 : i32
    %0 = arith.cmpi eq, %arg1, %c0_i32 : i32
    %1 = arith.extui %0 : i1 to i32
    %c0_i32_0 = arith.constant 0 : i32
    %2 = arith.cmpi ne, %1, %c0_i32_0 : i32
    scf.if %2 {
      %c0_30 = arith.constant 0 : index
      %c0_31 = arith.constant 0 : index
      %c0_32 = arith.constant 0 : index
      %49 = vector.load %arg2[%c0_30, %c0_31, %c0_32] : memref<1x4x128xbf16, #tpu.memory_space<vmem>>, vector<1x4x128xbf16>
      %50 = vector.shape_cast %49 : vector<1x4x128xbf16> to vector<4x128xbf16>
      %c0_33 = arith.constant 0 : index
      %c0_34 = arith.constant 0 : index
      %51 = vector.load %arg8[%c0_33, %c0_34] : memref<4x256xbf16, #tpu.memory_space<vmem>>, vector<4x128xbf16>
      tpu.vector_store %arg8[%c0_33, %c0_34], %50 {strides = array<i32>} : memref<4x256xbf16, #tpu.memory_space<vmem>>, vector<4x128xbf16>,
    } else {
    }
    %c0 = arith.constant 0 : index
    %c0_1 = arith.constant 0 : index
    %c0_2 = arith.constant 0 : index
    %3 = vector.load %arg3[%c0, %c0_1, %c0_2] : memref<1x4x128xbf16, #tpu.memory_space<vmem>>, vector<1x4x128xbf16>
    %4 = vector.shape_cast %3 : vector<1x4x128xbf16> to vector<4x128xbf16>
    %c0_3 = arith.constant 0 : index
    %c128 = arith.constant 128 : index
    %5 = vector.load %arg8[%c0_3, %c128] : memref<4x256xbf16, #tpu.memory_space<vmem>>, vector<4x128xbf16>
    tpu.vector_store %arg8[%c0_3, %c128], %4 {strides = array<i32>} : memref<4x256xbf16, #tpu.memory_space<vmem>>, vector<4x128xbf16>,
    %c0_4 = arith.constant 0 : index
    %c0_5 = arith.constant 0 : index
    %6 = vector.load %arg8[%c0_4, %c0_5] : memref<4x256xbf16, #tpu.memory_space<vmem>>, vector<4x256xbf16>
    %7 = vector.extract_strided_slice %6 {offsets = [0, 121], sizes = [4, 128], strides = [1, 1]} : vector<4x256xbf16> to vector<4x128xbf16>
    %c0_6 = arith.constant 0 : index
    %c0_7 = arith.constant 0 : index
    %8 = vector.load %arg9[%c0_6, %c0_7] : memref<32x128xbf16, #tpu.memory_space<vmem>>, vector<4x128xbf16>
    tpu.vector_store %arg9[%c0_6, %c0_7], %7 {strides = array<i32>} : memref<32x128xbf16, #tpu.memory_space<vmem>>, vector<4x128xbf16>,
    %9 = vector.extract_strided_slice %6 {offsets = [0, 122], sizes = [4, 128], strides = [1, 1]} : vector<4x256xbf16> to vector<4x128xbf16>
    %c4 = arith.constant 4 : index
    %c0_8 = arith.constant 0 : index
    %10 = vector.load %arg9[%c4, %c0_8] : memref<32x128xbf16, #tpu.memory_space<vmem>>, vector<4x128xbf16>
    tpu.vector_store %arg9[%c4, %c0_8], %9 {strides = array<i32>} : memref<32x128xbf16, #tpu.memory_space<vmem>>, vector<4x128xbf16>,
    %11 = vector.extract_strided_slice %6 {offsets = [0, 123], sizes = [4, 128], strides = [1, 1]} : vector<4x256xbf16> to vector<4x128xbf16>
    %c8 = arith.constant 8 : index
    %c0_9 = arith.constant 0 : index
    %12 = vector.load %arg9[%c8, %c0_9] : memref<32x128xbf16, #tpu.memory_space<vmem>>, vector<4x128xbf16>
    tpu.vector_store %arg9[%c8, %c0_9], %11 {strides = array<i32>} : memref<32x128xbf16, #tpu.memory_space<vmem>>, vector<4x128xbf16>,
    %13 = vector.extract_strided_slice %6 {offsets = [0, 124], sizes = [4, 128], strides = [1, 1]} : vector<4x256xbf16> to vector<4x128xbf16>
    %c12 = arith.constant 12 : index
    %c0_10 = arith.constant 0 : index
    %14 = vector.load %arg9[%c12, %c0_10] : memref<32x128xbf16, #tpu.memory_space<vmem>>, vector<4x128xbf16>
    tpu.vector_store %arg9[%c12, %c0_10], %13 {strides = array<i32>} : memref<32x128xbf16, #tpu.memory_space<vmem>>, vector<4x128xbf16>,
    %15 = vector.extract_strided_slice %6 {offsets = [0, 125], sizes = [4, 128], strides = [1, 1]} : vector<4x256xbf16> to vector<4x128xbf16>
    %c16 = arith.constant 16 : index
    %c0_11 = arith.constant 0 : index
    %16 = vector.load %arg9[%c16, %c0_11] : memref<32x128xbf16, #tpu.memory_space<vmem>>, vector<4x128xbf16>
    tpu.vector_store %arg9[%c16, %c0_11], %15 {strides = array<i32>} : memref<32x128xbf16, #tpu.memory_space<vmem>>, vector<4x128xbf16>,
    %17 = vector.extract_strided_slice %6 {offsets = [0, 126], sizes = [4, 128], strides = [1, 1]} : vector<4x256xbf16> to vector<4x128xbf16>
    %c20 = arith.constant 20 : index
    %c0_12 = arith.constant 0 : index
    %18 = vector.load %arg9[%c20, %c0_12] : memref<32x128xbf16, #tpu.memory_space<vmem>>, vector<4x128xbf16>
    tpu.vector_store %arg9[%c20, %c0_12], %17 {strides = array<i32>} : memref<32x128xbf16, #tpu.memory_space<vmem>>, vector<4x128xbf16>,
    %19 = vector.extract_strided_slice %6 {offsets = [0, 127], sizes = [4, 128], strides = [1, 1]} : vector<4x256xbf16> to vector<4x128xbf16>
    %c24 = arith.constant 24 : index
    %c0_13 = arith.constant 0 : index
    %20 = vector.load %arg9[%c24, %c0_13] : memref<32x128xbf16, #tpu.memory_space<vmem>>, vector<4x128xbf16>
    tpu.vector_store %arg9[%c24, %c0_13], %19 {strides = array<i32>} : memref<32x128xbf16, #tpu.memory_space<vmem>>, vector<4x128xbf16>,
    %21 = vector.extract_strided_slice %6 {offsets = [0, 128], sizes = [4, 128], strides = [1, 1]} : vector<4x256xbf16> to vector<4x128xbf16>
    %c28 = arith.constant 28 : index
    %c0_14 = arith.constant 0 : index
    %22 = vector.load %arg9[%c28, %c0_14] : memref<32x128xbf16, #tpu.memory_space<vmem>>, vector<4x128xbf16>
    tpu.vector_store %arg9[%c28, %c0_14], %21 {strides = array<i32>} : memref<32x128xbf16, #tpu.memory_space<vmem>>, vector<4x128xbf16>,
    %c0_15 = arith.constant 0 : index
    %c0_16 = arith.constant 0 : index
    %23 = vector.load %arg4[%c0_15, %c0_16] : memref<8x32xbf16, #tpu.memory_space<vmem>>, vector<8x32xbf16>
    %c0_17 = arith.constant 0 : index
    %c0_18 = arith.constant 0 : index
    %24 = vector.load %arg9[%c0_17, %c0_18] : memref<32x128xbf16, #tpu.memory_space<vmem>>, vector<32x128xbf16>
    %cst = arith.constant dense<0.000000e+00> : vector<8x128xf32>
    %25 = tpu.matmul %23, %24, %cst {dimension_numbers = #tpu.dot_dimension_numbers<[1], [0], [0], [1], [0, 0, 1, 1], [], []>} : vector<8x32xbf16>, vector<32x128xbf16>, vector<8x128xf32> -> vector<8x128xf32>
    %c0_19 = arith.constant 0 : index
    %c0_20 = arith.constant 0 : index
    %26 = vector.load %arg5[%c0_19, %c0_20] : memref<8x3xf32, #tpu.memory_space<vmem>>, vector<8x3xf32>
    %27 = vector.extract_strided_slice %26 {offsets = [0, 0], sizes = [8, 1], strides = [1, 1]} : vector<8x3xf32> to vector<8x1xf32>
    %28 = vector.broadcast %27 : vector<8x1xf32> to vector<8x128xf32>
    %29 = arith.addf %25, %28 : vector<8x128xf32>
    %cst_21 = arith.constant 0.000000e+00 : f32
    %30 = vector.broadcast %cst_21 : f32 to vector<8x128xf32>
    %31 = arith.maximumf %29, %30 : vector<8x128xf32>
    %32 = vector.extract_strided_slice %26 {offsets = [0, 1], sizes = [8, 1], strides = [1, 1]} : vector<8x3xf32> to vector<8x1xf32>
    %33 = vector.broadcast %32 : vector<8x1xf32> to vector<8x128xf32>
    %34 = arith.mulf %31, %33 : vector<8x128xf32>
    %35 = vector.extract_strided_slice %26 {offsets = [0, 2], sizes = [8, 1], strides = [1, 1]} : vector<8x3xf32> to vector<8x1xf32>
    %36 = vector.broadcast %35 : vector<8x1xf32> to vector<8x128xf32>
    %37 = arith.addf %34, %36 : vector<8x128xf32>
    %38 = vector.extract_strided_slice %6 {offsets = [0, 124], sizes = [4, 128], strides = [1, 1]} : vector<4x256xbf16> to vector<4x128xbf16>
    %c0_22 = arith.constant 0 : index
    %c0_23 = arith.constant 0 : index
    %39 = vector.load %arg6[%c0_22, %c0_23] : memref<8x4xbf16, #tpu.memory_space<vmem>>, vector<8x4xbf16>
    %cst_24 = arith.constant dense<0.000000e+00> : vector<8x128xf32>
    %40 = tpu.matmul %39, %38, %cst_24 {dimension_numbers = #tpu.dot_dimension_numbers<[1], [0], [0], [1], [0, 0, 1, 1], [], []>} : vector<8x4xbf16>, vector<4x128xbf16>, vector<8x128xf32> -> vector<8x128xf32>
    %41 = arith.addf %40, %37 : vector<8x128xf32>
    %c0_25 = arith.constant 0 : index
    %c0_26 = arith.constant 0 : index
    %c0_27 = arith.constant 0 : index
    %42 = vector.load %arg7[%c0_25, %c0_26, %c0_27] : memref<1x8x128xf32, #tpu.memory_space<vmem>>, vector<1x8x128xf32>
    %43 = vector.shape_cast %42 : vector<1x8x128xf32> to vector<8x128xf32>
    %44 = vector.shape_cast %41 : vector<8x128xf32> to vector<1x8x128xf32>
    tpu.vector_store %arg7[%c0_25, %c0_26, %c0_27], %44 {strides = array<i32>} : memref<1x8x128xf32, #tpu.memory_space<vmem>>, vector<1x8x128xf32>,
    %c1_i32 = arith.constant 1 : i32
    %45 = arith.addi %arg1, %c1_i32 : i32
    %c1_i32_28 = arith.constant 1 : i32
    %46 = arith.cmpi slt, %45, %c1_i32_28 : i32
    %47 = arith.extui %46 : i1 to i32
    %c0_i32_29 = arith.constant 0 : i32
    %48 = arith.cmpi ne, %47, %c0_i32_29 : i32
    scf.if %48 {
      %49 = vector.extract_strided_slice %6 {offsets = [0, 128], sizes = [4, 128], strides = [1, 1]} : vector<4x256xbf16> to vector<4x128xbf16>
      %c0_30 = arith.constant 0 : index
      %c0_31 = arith.constant 0 : index
      %50 = vector.load %arg8[%c0_30, %c0_31] : memref<4x256xbf16, #tpu.memory_space<vmem>>, vector<4x128xbf16>
      tpu.vector_store %arg8[%c0_30, %c0_31], %49 {strides = array<i32>} : memref<4x256xbf16, #tpu.memory_space<vmem>>, vector<4x128xbf16>,
    } else {
    }
    return
  }
  func.func @transform_0(%arg0: i32, %arg1: i32) -> (i32, i32, i32) {
    %c0_i32 = arith.constant 0 : i32
    %c0_i32_0 = arith.constant 0 : i32
    %c0_i32_1 = arith.constant 0 : i32
    return %arg0, %c0_i32, %c0_i32_0 : i32, i32, i32
  }
  func.func @transform_1(%arg0: i32, %arg1: i32) -> (i32, i32, i32) {
    %c0_i32 = arith.constant 0 : i32
    %c0_i32_0 = arith.constant 0 : i32
    return %arg0, %c0_i32, %arg1 : i32, i32, i32
  }
  func.func @transform_2(%arg0: i32, %arg1: i32) -> (i32, i32) {
    %c0_i32 = arith.constant 0 : i32
    %c0_i32_0 = arith.constant 0 : i32
    %c0_i32_1 = arith.constant 0 : i32
    return %c0_i32, %c0_i32_0 : i32, i32
  }
  func.func @transform_3(%arg0: i32, %arg1: i32) -> (i32, i32) {
    %c0_i32 = arith.constant 0 : i32
    %c0_i32_0 = arith.constant 0 : i32
    %c0_i32_1 = arith.constant 0 : i32
    return %c0_i32, %c0_i32_0 : i32, i32
  }
  func.func @transform_4(%arg0: i32, %arg1: i32) -> (i32, i32) {
    %c0_i32 = arith.constant 0 : i32
    %c0_i32_0 = arith.constant 0 : i32
    %c0_i32_1 = arith.constant 0 : i32
    return %c0_i32, %c0_i32_0 : i32, i32
  }
  func.func @transform_5(%arg0: i32, %arg1: i32) -> (i32, i32, i32) {
    %c0_i32 = arith.constant 0 : i32
    %c0_i32_0 = arith.constant 0 : i32
    return %arg0, %c0_i32, %arg1 : i32, i32, i32
  }
}

</mosaic_0001>

<bundles_post_ra>
// kernel: tpu_custom_call.1
= control target key start
LH: loop header
LB: loop body
LE: loop exit
PB: predicated region body
PF: predicated region fallthrough
CT: control target
= control target key end

     0   :  { %10 = vsyncpa [#allocation5], 0  ;;  %s928_s0 = inlined_call_operand.vmem [shape: bf16[2,4,128], index: 0, kind: input, shape index: {}]   ;;  %s929_s1 = inlined_call_operand.vmem [shape: bf16[2,4,128], index: 1, kind: input, shape index: {}]   ;;  %s930_s2 = inlined_call_operand.vmem [shape: bf16[8,32], index: 2, kind: input, shape index: {}]   ;;  %s931_s3 = inlined_call_operand.vmem [shape: f32[8,3], index: 3, kind: input, shape index: {}]   ;;  %s932_s4 = inlined_call_operand.vmem [shape: bf16[8,4], index: 4, kind: input, shape index: {}]   ;;  %s933_s5 = inlined_call_operand.hbm [shape: f32[2,8,128], index: 5, kind: output, shape index: {}]  }
   0x1   :  { %12 = vsyncpa [#allocation5 + $0x1], 0  ;;  %s812_s18 = smov 0   ;;  %s814_s19 = smov 0  }
   0x2   :  { %s816_s20 = smov 0   ;;  %s818_s21 = smov 0  }
   0x3   :  { %s820_s22 = smov 0   ;;  %s822_s23 = smov 0  }
   0x4 LB: > { %s580_s24 = sadd.s32 4294967295, %s766_s23   ;;  %s581_s25 = sadd.s32 4294967294, %s766_s23   ;;  %s766_s23 = sphi %s822_s23, %s18_s23   ;;  %s762_s22 = sphi %s820_s22, %s940_s22   ;;  %s758_s21 = sphi %s818_s21, %s939_s21   ;;  %s754_s20 = sphi %s816_s20, %s938_s20   ;;  %s750_s19 = sphi %s814_s19, %s937_s19   ;;  %s746_s18 = sphi %s812_s18, %s936_s18  }
   0x5   : > { %s30_s26 = sadd.s32 1, %s762_s22  ;;  %s156_s27 = sadd.s32 1, %s754_s20 }
   0x6   : > { %p32_p0 = scmp.ge.s32.totalorder %s30_s26, 2  ;;  %p166_p1 = scmp.ne.s32.totalorder %s754_s20, %s750_s19 }
   0x7   : > { %p167_p2 = scmp.eq.s32.totalorder %s580_s24, 1  ;;  %p172_p3 = scmp.ne.s32.totalorder %s750_s19, %s746_s18 }
   0x8   : > { %s942_s26 = smov (%p32_p0, %s30_s26), 0  ;;  %p173_p5 = scmp.eq.s32.totalorder %s581_s25, 1 }
   0x9   : > { %p852_p4 = por %p167_p2, %p166_p1  ;;  %s151_s29 = ssub.s32 %s762_s22, %s942_s26 }
   0xa   : > { %p584_p6 = scmp.ge.s32.totalorder %s766_s23, 1  ;;  %p154_p7 = scmp.eq.s32.totalorder %s151_s29, 0 }
   0xb   : > { %p859_p8 = por %p173_p5, %p172_p3  ;;  %p217_p9 = scmp.lt.s32.totalorder %s766_s23, 3 }
   0xc   : > { %s865_s6 = scalar_select %p154_p7, %s754_s20, %s156_s27  }
   0xd   : > { %p218_p10 = pnand %p584_p6, %p217_p9 }
   0xe   : > { %p251_p11 = scmp.lt.s32.totalorder (!%p218_p10), %s758_s21, 1  ;;  %s769_s15 = smov (!%p218_p10), 3  }
   0xf   : > { %221 = sbr.rel (%p218_p10) target bundleno = 393 (0x189), region = 40  ;;  %s770_s16 = smov (!%p218_p10), 1  }
  0x10   : > { %s772_s17 = smov (!%p218_p10), 2   ;;  %s773_s24 = smov (!%p218_p10), 7  }
  0x11   : > { %s774_s25 = smov (!%p218_p10), 6   ;;  %s775_s27 = smov (!%p218_p10), 5  }
  0x12   : > { %s776_s29 = smov (!%p218_p10), 4   ;;  %s248_s13 = sand.u32 (!%p218_p10), 1, %s750_s19  }
  0x14   : > { %s252_s7 = scalar_select %p251_p11, %s758_s21, 1  ;;  %v768_v0 = vmov 1983009808   ;;  %v276_v2 = vlaneseq  ;;  %v771_v13 = vmov 0.0   ;;  %vm777_vm0 = vmmov 0   ;;  %v345_v15 = vld [vmem:[%s931_s3] sm:$0xff] }
  0x15   : > { %v274_v1 = vunpack.c.l.s4 %v768_v0  ;;  %601 = vmatprep.subr.bf16.mxu0 %v771_v13  ;;  %609 = vmatprep.subr.bf16.mxu1 %v771_v13  ;;  %v778_v16 = vmov 0   ;;  %v779_v17 = vmov 1   ;;  %v780_v18 = vmov 2   ;;  %v418_v45 = vld [vmem:[%s932_s4] sm:$0xf] }
  0x16   : > { %s586_s8 = sshll.u32 %s252_s7, 1  ;;  %v277_v6 = vshrl.u32 %v276_v2, 7  ;;  %605 = vmatprep.mubr.msk.bf16.mxu0 %vm777_vm0, %v771_v13  ;;  %611 = vmatprep.mubr.msk.bf16.mxu1 %vm777_vm0, %v771_v13  ;;  %vm319_vm1 = vcmask 23552   ;;  %vm333_vm2 = vcmask 7168   ;;  %vm326_vm3 = vcmask 15360  }
  0x17   : > { %s254_s11 = scalar_lea.vmem %s928_s0, %s586_s8  ;;  %s261_s14 = scalar_lea.vmem %s929_s1, %s586_s8  ;;  %v275_v5 = vunpack.c.0.s8 %v274_v1  ;;  %683 = vset.pattern.permute.xlu1 %v778_v16  ;;  %684 = vset.pattern.permute.xlu0 %v779_v17  ;;  %vm283_vm4 = vcmask 56320   ;;  %vm298_vm5 = vcmask 48128   ;;  %vm305_vm6 = vcmask 39936   ;;  %v340_v47 = vld [vmem:[%s930_s2] sm:$0xf] }
  0x18   : > { %v267_v3 = vld [vmem:[%s254_s11] sm:$0x3]  ;;  %vm312_vm7 = vcmask 31744   ;;  %vm429_vm8 = vcmask 1041408   ;;  %vm363_vm9 = vcmask 261120   ;;  %s781_s8 = smov [#allocation4]  }
  0x19   : > { %v269_v4 = vld [vmem:[%s261_s14] sm:$0x3]  ;;  %268 = vst [vmem:[#allocation2] sm:$0x3] %v267_v3  ;;  %v278_v7 = vsub.s32 %v275_v5, %v277_v6  ;;  %s585_s14 = sshll.u32 %s248_s13, 3  ;;  %s694_s9 = sshll.u32 %s781_s8, 4  ;;  %s695_s9 = int_to_ptr.vmem [resolvable:$false] %s694_s9 }
  0x1a   : > { %270 = vst [vmem:[#allocation2 + $0x2] sm:$0x3] %v269_v4 }
  0x21   : > { %v271_v8 = vld [vmem:[#allocation2] sm:$0xf] }
  0x22   : > { %v279_v9 = vrot.slane %v271_v8, %v278_v7  ;;  %v287_v10 = vcombine.low %v271_v8, %v271_v8 }
  0x24   : > { %316 = vrot.lane.b32.xlu0 %v279_v9, %s769_s15  ;;  %330 = vrot.lane.b32.xlu1 %v279_v9, %s770_s16  ;;  %v294_v11 = vrot.slane %v287_v10, %v278_v7  ;;  %v419_v14 = vcombine.high %v279_v9, %v279_v9  ;;  %s593_s15 = sshll.u32 %s758_s21, 7  ;;  %s250_s16 = scalar_lea.vmem [#allocation4], %s585_s14 }
  0x25   : > { %s696_s21 = scalar_lea.vmem %s695_s9, 256 }
  0x26   : > { %v337_v12 = vrot.slane %v294_v11, 4 }
  0x28   : > { %339 = vst [vmem:[#allocation3 + $0xc] sm:$0xc] %v337_v12  ;;  %323 = vrot.lane.b32.xlu0 %v294_v11, %s772_s17  ;;  %280 = vrot.lane.b32.xlu1 %v279_v9, %s773_s24  ;;  %s497_s17 = sshll.u32 %s250_s16, 4  ;;  %s498_s17 = int_to_ptr.vmem [resolvable:$true] %s497_s17 }
  0x29   : > { %s690_s7 = scalar_lea.vmem %s498_s17, 128  ;;  %p697_p1 = scmp.lt.s32.totalorder %s498_s17, %s695_s9 }
  0x2a   : > { %p691_p12 = scmp.ne.s32.totalorder %s498_s17, %s690_s7  ;;  %p698_p2 = scmp.lt.s32.totalorder %s696_s21, %s690_s7 }
  0x2c   : > { %295 = vrot.lane.b32.xlu0 %v294_v11, %s774_s25  ;;  %302 = vrot.lane.b32.xlu1 %v279_v9, %s775_s27  ;;  %s495_s27 = scalar_lea.hbm %s933_s5, %s593_s15  ;;  %p692_p13 = pnand %p691_p12, %p852_p4 }
  0x2d   : > { %p699_p3 = por %p698_p2, %p697_p1 }
  0x2e   : > { %p693_p0 = pneg %p692_p13 }
  0x30   : > { %309 = vrot.lane.b32.xlu0 %v294_v11, %s776_s29  ;;  %420 = vrot.lane.b32.xlu1 %v279_v9, %s776_s29  ;;  %p700_p5 = pnand %p699_p3, %p693_p0 }
  0x34   : > { %422 = vrot.lane.b32.xlu0 %v419_v14, %s776_s29  ;;  %348 = vperm.xlu1 %683, %v345_v15   ;;  %s483_s29 = scalar_lea.sflag [#allocation5], %s248_s13 }
  0x38   : > { %409 = vperm.xlu0 %684, %v345_v15   ;;  %685 = vset.pattern.permute.xlu1 %v780_v18 }
  0x39   : > { %414 = vperm.xlu1 %685, %v345_v15  }
  0x3c   : > { %686 = vset.pattern.permute.xlu0 %v780_v18 }
  0x96   : > { %v317_v19 = vpop.permute.xlu0 %316  ;;  %v331_v20 = vpop.permute.xlu1 %330 }
  0x97   : > { %v318_v21 = vrot.slane %v317_v19, 4  ;;  %v332_v22 = vrot.slane %v331_v20, 4 }
  0x99   : > { %v320_v23 = vsel %vm319_vm1, %v317_v19, %v318_v21  ;;  %v334_v24 = vsel %vm333_vm2, %v331_v20, %v332_v22 }
  0x9a   : > { %322 = vst [vmem:[#allocation3 + $0x8] sm:$0x3] %v320_v23  ;;  %336 = vst [vmem:[#allocation3 + $0xc] sm:$0x3] %v334_v24  ;;  %v324_v25 = vpop.permute.xlu0 %323  ;;  %v281_v26 = vpop.permute.xlu1 %280 }
  0x9b   : > { %v325_v27 = vrot.slane %v324_v25, 4  ;;  %v282_v28 = vrot.slane %v281_v26, 4 }
  0x9d   : > { %v327_v29 = vsel %vm326_vm3, %v324_v25, %v325_v27  ;;  %v284_v30 = vsel %vm283_vm4, %v281_v26, %v282_v28 }
  0x9e   : > { %329 = vst [vmem:[#allocation3 + $0x8] sm:$0xc] %v327_v29  ;;  %286 = vst [vmem:[#allocation3] sm:$0x3] %v284_v30  ;;  %v296_v31 = vpop.permute.xlu0 %295  ;;  %v303_v32 = vpop.permute.xlu1 %302 }
  0x9f   : > { %v297_v33 = vrot.slane %v296_v31, 4  ;;  %v304_v34 = vrot.slane %v303_v32, 4 }
  0xa1   : > { %v299_v35 = vsel %vm298_vm5, %v296_v31, %v297_v33  ;;  %v306_v36 = vsel %vm305_vm6, %v303_v32, %v304_v34 }
  0xa2   : > { %301 = vst [vmem:[#allocation3] sm:$0xc] %v299_v35  ;;  %308 = vst [vmem:[#allocation3 + $0x4] sm:$0x3] %v306_v36  ;;  %v310_v37 = vpop.permute.xlu0 %309  ;;  %v421_v39 = vpop.permute.xlu1 %420 }
  0xa3   : > { %v311_v38 = vrot.slane %v310_v37, 4 }
  0xa5   : > { %v313_v40 = vsel %vm312_vm7, %v310_v37, %v311_v38  ;;  %v688_v41 = vld [vmem:[#allocation3 + $0x8] sm:$0xff]  }
  0xa6   : > { %315 = vst [vmem:[#allocation3 + $0x4] sm:$0xc] %v313_v40  ;;  %v423_v42 = vpop.permute.xlu0 %422  ;;  %602 = vmatpush3.bf16.msra.mxu0 %v688_v41 }
  0xa7   : > { %v424_v43 = vsel %vm312_vm7, %v421_v39, %v423_v42  ;;  %603 = vmatprep.subr.bf16.mxu0 %v771_v13 }
  0xa8   : > { %v431_v44 = vsel %vm429_vm8, %v424_v43, 0 }
  0xa9   : > { %610 = vmatpush3.bf16.msra.mxu1 %v431_v44 }
  0xac   : > { %612 = vmatmul.mubr.msk.bf16.vlgmr.msra.gmra.mxu1 %vm312_vm7, %v418_v45 }
  0xad   : > { %v689_v46 = vld [vmem:[#allocation3] sm:$0xff]  }
  0xae   : > { %604 = vmatpush3.bf16.msra.mxu0 %v689_v46 }
  0xaf   : > { %v349_v50 = vpop.permute.xlu1 %348 }
  0xb1   : > { %606 = vmatmul.mubr.msk.bf16.vlgmr.msra.gmra.mxu0 %vm363_vm9, %v340_v47 }
  0xb3   : > { %v410_v56 = vpop.permute.xlu0 %409 }
  0xb4   : > { %v415_v59 = vpop.permute.xlu1 %414 }
 0x16c   : > { %v467_v48 = vpop.f32.mrf.mxu1 }
 0x16e   : > { %v613_v49 = vpop.f32.mrf.mxu1 }
 0x170   : > { %v470_v51 = vpop.f32.mrf.mxu1 }
 0x171   : > { %v401_v52 = vpop.f32.mrf.mxu0 }
 0x172   : > { %v614_v53 = vpop.f32.mrf.mxu1  ;;  %v402_v54 = vadd.f32 %v401_v52, %v349_v50 }
 0x173   : > { %v607_v55 = vpop.f32.mrf.mxu0 }
 0x174   : > { %v407_v57 = vmax.f32 %v402_v54, 0.0 }
 0x175   : > { %v404_v58 = vpop.f32.mrf.mxu0 }
 0x176   : > { %v412_v60 = vmul.f32 %v410_v56, %v407_v57 }
 0x177   : > { %v608_v61 = vpop.f32.mrf.mxu0 }
 0x178   : > { %v417_v62 = vadd.f32 %v415_v59, %v412_v60 }
 0x17a   : > { %v468_v63 = vadd.f32 %v467_v48, %v417_v62 }
 0x17c   : > { %473 = vst [vmem:[%s250_s16] sm:$0xff] %v468_v63 }
 0x17d   : > { %703 = shalt.err (!%p700_p5)
}
 0x17e   : > { %s704_s10 = scalar_lea.hbm %s495_s27, 128  ;;  %s708_s13 = scalar_lea.hbm %s933_s5, 256 }
 0x17f   : > { %p705_p6 = scmp.ne.s32.totalorder %s495_s27, %s704_s10  ;;  %p709_p10 = scmp.lt.s32.totalorder %s495_s27, %s933_s5 }
 0x180   : > { %p710_p11 = scmp.lt.s32.totalorder %s708_s13, %s704_s10 }
 0x181   : > { %p706_p7 = pnand %p705_p6, %p852_p4 }
 0x182   : > { %p711_p12 = por %p710_p11, %p709_p10 }
 0x183   : > { %p707_p9 = pneg %p706_p7 }
 0x185   : > { %p712_p13 = pnand %p711_p12, %p707_p9 }
 0x187   : > { %715 = shalt.err (!%p712_p13)
}
 0x188   : > { %615 = dma.vmem_to_hbm [thread:$0]  (%p852_p4), %s498_s17, 128, %s495_s27, %s483_s29  }
 0x189 PF: > { %p621_p0 = scmp.ge.s32.totalorder %s766_s23, 2  ;;  %s509_s16 = sand.u32 1, %s746_s18  }
 0x18a   : > { %s510_s24 = scalar_lea.sflag [#allocation5], %s509_s16 }
 0x18b   : > { %p618_p1 = pnand %p621_p0, %p859_p8 }
 0x18d   : > { %p619_p2 = pneg %p618_p1 }
 0x18f   : > { %741 = dma.done.wait (%p619_p2), %s510_s24, 128  }
 0x190   : > { %743 = vsyncadd (%p619_p2), %s510_s24, 4294967168  ;;  %s18_s23 = sadd.s32 1, %s766_s23   ;;  %s936_s18 = smov %s750_s19 }
 0x191   : > { %p15_p3 = scmp.ge.s32.totalorder %s18_s23, 4   ;;  %s937_s19 = smov %s754_s20 }
 0x192   : > { %s938_s20 = smov %s865_s6  ;;  %s939_s21 = smov %s762_s22 }
 0x193   : > { %s940_s22 = smov %s942_s26  ;;  %17 = sbr.rel (!%p15_p3) target bundleno = 4 (0x4), region = 86 }
 0x198   :  { %515 = vsyncpa [#allocation5], 1 }
 0x199   :  { %517 = vsyncpa [#allocation5 + $0x1], 1 }

</bundles_post_ra>
